<compile_context>
chip_gen: v5e
topology: v5e:2x2
jax: 0.10.0
libtpu: 0.0.40
codegen_flags: <defaults>
</compile_context>

<pallas_src>
import jax
import jax.numpy as jnp
from jax.experimental import pallas as pl
from jax.experimental.pallas import tpu as pltpu


def _round_up(x, m):
    return ((x + m - 1) // m) * m


def _cdiv(a, b):
    return (a + b - 1) // b


def _pad2(a, rows, cols):
    pr, pc = rows - a.shape[0], cols - a.shape[1]
    if pr or pc:
        a = jnp.pad(a, ((0, pr), (0, pc)))
    return a


def _vmem_capacity_bytes():
    # Per-TensorCore VMEM: 128 MiB on v5e/v6e, 64 MiB on v7x.  Fall back to the
    # conservative 64 MiB if the query is unavailable.
    try:
        cap = getattr(pltpu.get_tpu_info(), "vmem_capacity_bytes", None)
        if cap:
            return int(cap)
    except Exception:
        pass
    return 64 * 1024 * 1024


def _pmf_kernel(i_ref, w_hbm_ref, x_ref, yt_ref, o_ref, w_vmem, w_sem, a_ref):
    n = pl.program_id(1)

    # Recompute the user-tile activation A only when the user tile changes
    # (the item axis is the innermost grid axis, so n == 0 marks a new tile).
    @pl.when(n == 0)
    def _():
        # Grid-invariant W: one single-buffered VMEM copy via manual DMA,
        # overlapped with the row-sum reduction below (no double-buffer waste).
        w_copy = pltpu.make_async_copy(w_hbm_ref, w_vmem, w_sem)
        w_copy.start()

        i_blk = i_ref[...]
        row_sum = jnp.sum(i_blk.astype(jnp.float32), axis=1, keepdims=True)
        # Guard all-zero rows (user padding rows / empty users): the torch
        # reference would give inf/NaN there; we fall back to X @ Y.T.
        # pl.reciprocal(approx=True) would push this onto the EUP if the
        # tolerance allows; keep the exact reciprocal to match f32 tightly.
        inv = pl.reciprocal(jnp.maximum(row_sum, 1.0), approx=False)

        w_copy.wait()
        # (tm, n_item_p) @ (n_item_p, n_factor_p) -> (tm, n_factor_p) on MXU.
        iw = jnp.dot(i_blk, w_vmem[...], preferred_element_type=jnp.float32)
        a_ref[...] = x_ref[...] + iw * inv

    # (tm, n_factor_p) @ (n_factor_p, tn) -> lane-dense (tm, tn) output tile.
    a_blk = a_ref[...].astype(yt_ref.dtype)
    o_ref[...] = jnp.dot(
        a_blk, yt_ref[...], preferred_element_type=jnp.float32
    ).astype(o_ref.dtype)


def pmf_forward(I, W, X, Y, *, tm=256, tn=512, matmul_dtype=jnp.float32):
    n_user, n_item = I.shape
    n_factor = W.shape[1]
    assert W.shape == (n_item, n_factor)
    assert X.shape == (n_user, n_factor)
    assert Y.shape == (n_item, n_factor)

    m_dt = jnp.dtype(matmul_dtype)
    # Sub-32-bit dtypes pack along sublanes: keep the user tile sublane-aligned
    # (8 rows for f32, 16 rows for bf16).
    row_align = 8 * max(1, 4 // m_dt.itemsize)

    nf_p = _round_up(n_factor, 128)

    # ---- user (m) tile: fill the MXU rows, but keep >= 2 grid steps on the
    #      parallel axis when possible so both v7x TensorCores get work. ----
    tm = min(tm, _round_up(n_user, row_align))
    tm = max(row_align, (tm // row_align) * row_align)
    if _cdiv(n_user, tm) < 2 and tm > row_align:
        tm = max(row_align, _round_up(_cdiv(n_user, 2), row_align))

    # ---- item (n) tile: lane-dense multiple of 128 ----
    tn = min(tn, _round_up(n_item, 128))
    tn = max(128, (tn // 128) * 128)

    # ---- shrink tiles until the pipelined working set fits the VMEM budget ----
    def vmem_bytes(tm_, tn_, ni_p_):
        return (2 * tm_ * ni_p_ * m_dt.itemsize   # I tile (double-buffered)
                + 2 * tm_ * nf_p * 4              # X tile
                + 2 * nf_p * tn_ * m_dt.itemsize  # Y.T tile
                + 2 * tm_ * tn_ * 4               # out tile
                + ni_p_ * nf_p * m_dt.itemsize    # W scratch (single copy)
                + tm_ * nf_p * 4)                 # cached-A scratch

    cap = _vmem_capacity_bytes()
    budget = int(0.8 * cap)
    ni_p = _round_up(n_item, tn)
    while vmem_bytes(tm, tn, ni_p) > budget and tn > 128:
        tn = max(128, ((tn // 2) // 128) * 128)
        ni_p = _round_up(n_item, tn)
    while vmem_bytes(tm, tn, ni_p) > budget and tm > row_align:
        tm = max(row_align, ((tm // 2) // row_align) * row_align)
    nu_p = _round_up(n_user, tm)

    grid = (nu_p // tm, ni_p // tn)

    # ---- zero-pad to TPU-friendly shapes (exact for the matmuls) ----
    I_p = _pad2(I.astype(matmul_dtype), nu_p, ni_p)
    W_p = _pad2(W.astype(matmul_dtype), ni_p, nf_p)
    X_p = _pad2(X.astype(jnp.float32), nu_p, nf_p)
    Yt_p = _pad2(jnp.transpose(Y).astype(matmul_dtype), nf_p, ni_p)

    flops = 2 * nu_p * ni_p * nf_p * 2  # I@W plus A@Y.T
    bytes_accessed = (I_p.size * I_p.dtype.itemsize
                      + W_p.size * W_p.dtype.itemsize
                      + X_p.size * X_p.dtype.itemsize
                      + Yt_p.size * Yt_p.dtype.itemsize
                      + nu_p * ni_p * 4)
    vmem_limit = max(32 * 1024 * 1024,
                     min(cap, vmem_bytes(tm, tn, ni_p) + 16 * 1024 * 1024))

    out_p = pl.pallas_call(
        _pmf_kernel,
        out_shape=jax.ShapeDtypeStruct((nu_p, ni_p), jnp.float32),
        grid_spec=pltpu.PrefetchScalarGridSpec(
            num_scalar_prefetch=0,
            grid=grid,
            in_specs=[
                pl.BlockSpec((tm, ni_p), lambda m, n: (m, 0)),   # I (full item width)
                pl.BlockSpec(memory_space=pl.ANY),               # W stays in HBM
                pl.BlockSpec((tm, nf_p), lambda m, n: (m, 0)),   # X tile
                pl.BlockSpec((nf_p, tn), lambda m, n: (0, n)),   # Y.T tile
            ],
            out_specs=pl.BlockSpec((tm, tn), lambda m, n: (m, n)),
            scratch_shapes=[
                pltpu.VMEM((ni_p, nf_p), matmul_dtype),          # single-buffered W
                pltpu.SemaphoreType.DMA(()),                     # W DMA semaphore
                pltpu.VMEM((tm, nf_p), jnp.float32),             # cached A per user tile
            ],
        ),
        compiler_params=pltpu.CompilerParams(
            dimension_semantics=("parallel", "arbitrary"),
            vmem_limit_bytes=int(vmem_limit),
        ),
        cost_estimate=pl.CostEstimate(
            flops=int(flops), transcendentals=0,
            bytes_accessed=int(bytes_accessed)),
    )(I_p, W_p, X_p, Yt_p)

    return out_p[:n_user, :n_item]


def pmf_reference(I, W, X, Y):
    A = (I @ W) / jnp.sum(I, axis=1, keepdims=True)
    A = X + A
    return A @ Y.T


if __name__ == "__main__":
    # small, deterministic problem sizes
    n_user, n_item, n_factor = 16, 16, 32
    key = jax.random.PRNGKey(0)
    k_i, k_x, k_y, k_w = jax.random.split(key, 4)

    # binary indicator matrix; force column 0 to 1 so no row-sum is zero
    I = (jax.random.uniform(k_i, (n_user, n_item)) > 0.5).astype(jnp.float32)
    I = I.at[:, 0].set(1.0)

    X = jax.random.normal(k_x, (n_user, n_factor), dtype=jnp.float32)
    Y = jax.random.normal(k_y, (n_item, n_factor), dtype=jnp.float32)
    W = jax.random.normal(k_w, (n_item, n_factor), dtype=jnp.float32)

    ref = pmf_reference(I, W, X, Y)

    # Default f32 path: tight tolerance against the f32 JAX reference.
    out = jax.block_until_ready(pmf_forward(I, W, X, Y))
    assert out.shape == (n_user, n_item)
    assert jnp.allclose(out, ref, atol=1e-4, rtol=1e-4), "f32 mismatch vs reference"

    # Optional bf16-matmul path (perf feedback): exact for the 0/1 indicator,
    # ~0.4% rounding on W/Y/A, so compare with a loose tolerance.
    out_bf16 = jax.block_until_ready(
        pmf_forward(I, W, X, Y, matmul_dtype=jnp.bfloat16))
    assert out_bf16.shape == (n_user, n_item)
    assert jnp.allclose(out_bf16, ref, atol=0.25, rtol=0.05), "bf16 mismatch"

    print("KERNEL_OK")
</pallas_src>

<mosaic_0001>
module attributes {stable_mosaic.version = 11 : i64} {
  func.func @_pmf_kernel(%arg0: i32, %arg1: i32, %arg2: memref<8x128xf32, #tpu.memory_space<vmem>>, %arg3: memref<128x128xf32, #tpu.memory_space<any>>, %arg4: memref<8x128xf32, #tpu.memory_space<vmem>>, %arg5: memref<128x128xf32, #tpu.memory_space<vmem>>, %arg6: memref<8x128xf32, #tpu.memory_space<vmem>>, %arg7: memref<128x128xf32, #tpu.memory_space<vmem>>, %arg8: memref<!tpu.dma_semaphore, #tpu.memory_space<semaphore_mem>>, %arg9: memref<8x128xf32, #tpu.memory_space<vmem>>) attributes {dimension_semantics = [#tpu.dimension_semantics<parallel>, #tpu.dimension_semantics<arbitrary>], iteration_bounds = array<i64: 2, 1>, scalar_prefetch = 0 : i64, scratch_operands = 3 : i64, tpu.core_type = #tpu.core_type<tc>, window_params = [{transform_indices = @transform_0, window_bounds = array<i64: 8, 128>}, {}, {transform_indices = @transform_2, window_bounds = array<i64: 8, 128>}, {transform_indices = @transform_3, window_bounds = array<i64: 128, 128>}, {transform_indices = @transform_4, window_bounds = array<i64: 8, 128>}]} {
    %c0_i32 = arith.constant 0 : i32
    %0 = arith.cmpi eq, %arg1, %c0_i32 : i32
    %1 = arith.extui %0 : i1 to i32
    %c0_i32_0 = arith.constant 0 : i32
    %2 = arith.cmpi ne, %1, %c0_i32_0 : i32
    scf.if %2 {
      tpu.enqueue_dma source(%arg3 : memref<128x128xf32, #tpu.memory_space<any>>) target(%arg7 : memref<128x128xf32, #tpu.memory_space<vmem>>) target_semaphore(%arg8 : memref<!tpu.dma_semaphore, #tpu.memory_space<semaphore_mem>>)
      %c0_6 = arith.constant 0 : index
      %c0_7 = arith.constant 0 : index
      %7 = vector.load %arg2[%c0_6, %c0_7] : memref<8x128xf32, #tpu.memory_space<vmem>>, vector<8x128xf32>
      %cst_8 = arith.constant dense<0.000000e+00> : vector<8xf32>
      %8 = vector.multi_reduction <add>, %7, %cst_8 [1] : vector<8x128xf32> to vector<8xf32>
      %9 = vector.shape_cast %8 : vector<8xf32> to vector<8x1xf32>
      %cst_9 = arith.constant 1.000000e+00 : f32
      %10 = vector.broadcast %cst_9 : f32 to vector<8x1xf32>
      %11 = arith.maximumf %9, %10 : vector<8x1xf32>
      %12 = tpu.reciprocal %11 : vector<8x1xf32> -> vector<8x1xf32>
      tpu.wait_dma2 semaphore(%arg8 : memref<!tpu.dma_semaphore, #tpu.memory_space<semaphore_mem>>) src(%arg3 : memref<128x128xf32, #tpu.memory_space<any>>) dst(%arg7 : memref<128x128xf32, #tpu.memory_space<vmem>>)
      %c0_10 = arith.constant 0 : index
      %c0_11 = arith.constant 0 : index
      %13 = vector.load %arg7[%c0_10, %c0_11] : memref<128x128xf32, #tpu.memory_space<vmem>>, vector<128x128xf32>
      %cst_12 = arith.constant dense<0.000000e+00> : vector<8x128xf32>
      %14 = tpu.matmul %7, %13, %cst_12 {dimension_numbers = #tpu.dot_dimension_numbers<[1], [0], [0], [1], [0, 0, 1, 1], [], []>} : vector<8x128xf32>, vector<128x128xf32>, vector<8x128xf32> -> vector<8x128xf32>
      %c0_13 = arith.constant 0 : index
      %c0_14 = arith.constant 0 : index
      %15 = vector.load %arg4[%c0_13, %c0_14] : memref<8x128xf32, #tpu.memory_space<vmem>>, vector<8x128xf32>
      %16 = vector.broadcast %12 : vector<8x1xf32> to vector<8x128xf32>
      %17 = arith.mulf %14, %16 : vector<8x128xf32>
      %18 = arith.addf %15, %17 : vector<8x128xf32>
      %c0_15 = arith.constant 0 : index
      %c0_16 = arith.constant 0 : index
      %19 = vector.load %arg9[%c0_15, %c0_16] : memref<8x128xf32, #tpu.memory_space<vmem>>, vector<8x128xf32>
      tpu.vector_store %arg9[%c0_15, %c0_16], %18 {strides = array<i32>} : memref<8x128xf32, #tpu.memory_space<vmem>>, vector<8x128xf32>,
    } else {
    }
    %c0 = arith.constant 0 : index
    %c0_1 = arith.constant 0 : index
    %3 = vector.load %arg9[%c0, %c0_1] : memref<8x128xf32, #tpu.memory_space<vmem>>, vector<8x128xf32>
    %c0_2 = arith.constant 0 : index
    %c0_3 = arith.constant 0 : index
    %4 = vector.load %arg5[%c0_2, %c0_3] : memref<128x128xf32, #tpu.memory_space<vmem>>, vector<128x128xf32>
    %cst = arith.constant dense<0.000000e+00> : vector<8x128xf32>
    %5 = tpu.matmul %3, %4, %cst {dimension_numbers = #tpu.dot_dimension_numbers<[1], [0], [0], [1], [0, 0, 1, 1], [], []>} : vector<8x128xf32>, vector<128x128xf32>, vector<8x128xf32> -> vector<8x128xf32>
    %c0_4 = arith.constant 0 : index
    %c0_5 = arith.constant 0 : index
    %6 = vector.load %arg6[%c0_4, %c0_5] : memref<8x128xf32, #tpu.memory_space<vmem>>, vector<8x128xf32>
    tpu.vector_store %arg6[%c0_4, %c0_5], %5 {strides = array<i32>} : memref<8x128xf32, #tpu.memory_space<vmem>>, vector<8x128xf32>,
    return
  }
  func.func @transform_0(%arg0: i32, %arg1: i32) -> (i32, i32) {
    %c0_i32 = arith.constant 0 : i32
    %c0_i32_0 = arith.constant 0 : i32
    return %arg0, %c0_i32 : i32, i32
  }
  func.func @transform_2(%arg0: i32, %arg1: i32) -> (i32, i32) {
    %c0_i32 = arith.constant 0 : i32
    %c0_i32_0 = arith.constant 0 : i32
    return %arg0, %c0_i32 : i32, i32
  }
  func.func @transform_3(%arg0: i32, %arg1: i32) -> (i32, i32) {
    %c0_i32 = arith.constant 0 : i32
    %c0_i32_0 = arith.constant 0 : i32
    return %c0_i32, %arg1 : i32, i32
  }
  func.func @transform_4(%arg0: i32, %arg1: i32) -> (i32, i32) {
    %c0_i32 = arith.constant 0 : i32
    return %arg0, %arg1 : i32, i32
  }
}

</mosaic_0001>

<bundles_post_ra>
// kernel: tpu_custom_call.1
= control target key start
LH: loop header
LB: loop body
LE: loop exit
PB: predicated region body
PF: predicated region fallthrough
CT: control target
= control target key end

     0   :  { %s1029_s0 = inlined_call_operand.hbm [shape: f32[16,128], index: 0, kind: input, shape index: {}]   ;;  %s1030_s1 = inlined_call_operand.hbm [shape: f32[128,128], index: 1, kind: input, shape index: {}]   ;;  %s1031_s2 = inlined_call_operand.hbm [shape: f32[16,128], index: 2, kind: input, shape index: {}]   ;;  %s1032_s3 = inlined_call_operand.hbm [shape: f32[128,128], index: 3, kind: input, shape index: {}]   ;;  %s1033_s4 = inlined_call_operand.hbm [shape: f32[16,128], index: 4, kind: output, shape index: {}]  }
   0x1   :  { %1037 = sst [smem:[#allocation25_spill]] %s1032_s3 }
   0x2   :  { %9 = vsyncpa [#allocation6], 0 }
   0x3   :  { %11 = vsyncpa [#allocation6 + $0x1], 0 }
   0x4   :  { %12 = vsyncpa [#allocation9], 0 }
   0x5   :  { %14 = vsyncpa [#allocation9 + $0x1], 0 }
   0x6   :  { %15 = vsyncpa [#allocation7], 0 }
   0x7   :  { %17 = vsyncpa [#allocation7 + $0x1], 0  ;;  %s856_s15 = smov 0   ;;  %s858_s16 = smov 0  }
   0x8   :  { %s860_s17 = smov 0   ;;  %s862_s18 = smov 0  }
   0x9   :  { %s864_s19 = smov 0   ;;  %s866_s20 = smov 0  }
   0xa LB: > { %1038 = sst [smem:[#allocation21_spill]] %s813_s17  ;;  %s887_s21 = sadd.s32 4294967295, %s825_s20   ;;  %s825_s20 = sphi %s866_s20, %s23_s20   ;;  %s821_s19 = sphi %s864_s19, %s1051_s19   ;;  %s817_s18 = sphi %s862_s18, %s1050_s18   ;;  %s813_s17 = sphi %s860_s17, %s1049_s17   ;;  %s809_s16 = sphi %s858_s16, %s1053_s16   ;;  %s805_s15 = sphi %s856_s15, %s1052_s15  }
   0xb   : > { %1039 = sst [smem:[#allocation22_spill]] %s821_s19  ;;  %p519_p0 = scmp.ge.s32.totalorder %s825_s20, 1 }
   0xc   : > { %p56_p1 = scmp.eq.s32.totalorder %s887_s21, 0  ;;  %p146_p2 = scmp.lt.s32.totalorder %s825_s20, 3 }
   0xd   : > { %s1040_s3 = sld [smem:[#allocation25_spill]]  ;;  %s827_s26 = smov [#allocation10]  }
   0xe   : > { %p895_p3 = pnand %p519_p0, %p146_p2  ;;  %s161_s27 = sshll.u32 %s827_s26, 4  ;;  %s162_s27 = int_to_ptr.vmem [resolvable:$true] %s161_s27 }
   0xf   : > { %p521_p6 = scmp.ge.s32.totalorder %s825_s20, 2  ;;  %s828_s28 = smov 128  }
  0x10   : > { %p546_p4 = pneg %p895_p3  ;;  %s829_s29 = smov 8  }
  0x11   : > { %s518_s30 = sadd.s32 4294967294, %s825_s20   ;;  %s35_s5 = sadd.s32 1, %s821_s19 }
  0x12   : > { %p547_p5 = pnand %p546_p4, %p56_p1  ;;  %s42_s6 = sadd.s32 1, %s813_s17 }
  0x13   : > { %s159_s24 = sshll.u32 %s1040_s3, 4  ;;  %p37_p7 = scmp.ge.s32.totalorder %s35_s5, 2  ;;  %s160_s24 = int_to_ptr.hbm [resolvable:$true] %s159_s24 }
  0x14   : > { %549 = dma.hbm_to_vmem [thread:$0]  (!%p547_p5), %s160_s24, 2048, %s162_s27, [#allocation9], %s828_s28, %s828_s28, %s829_s29  }
  0x15   : > { %p49_p8 = scmp.ne.s32.totalorder %s813_s17, %s809_s16  ;;  %p50_p9 = scmp.eq.s32.totalorder %s825_s20, 0 }
  0x16   : > { %p55_p10 = scmp.ne.s32.totalorder %s809_s16, %s805_s15  ;;  %s1055_s5 = smov (%p37_p7, %s35_s5), 0 }
  0x17   : > { %1042 = sst [smem:[#allocation23_spill]] %s1055_s5  ;;  %p914_p11 = por %p50_p9, %p49_p8 }
  0x18   : > { %p920_p12 = por %p56_p1, %p55_p10  ;;  %s39_s9 = ssub.s32 %s821_s19, %s1055_s5 }
  0x19   : > { %p133_p13 = scmp.eq.s32.totalorder %s887_s21, 1  ;;  %p40_p0 = scmp.eq.s32.totalorder %s39_s9, 0 }
  0x1a   : > { %p139_p2 = scmp.eq.s32.totalorder %s518_s30, 1  ;;  %p562_p5 = scmp.lt.s32.totalorder %s825_s20, 2 }
  0x1b   : > { %p927_p4 = por %p133_p13, %p49_p8  ;;  %s175_s13 = sand.u32 1, %s813_s17  }
  0x1c   : > { %s933_s11 = scalar_select %p40_p0, %s813_s17, %s42_s6  }
  0x1d   : > { %p935_p7 = por %p139_p2, %p55_p10  ;;  %s522_s14 = sshll.u32 %s175_s13, 3 }
  0x1e   : > { %1046 = sst [smem:[#allocation24_spill]] %s933_s11  ;;  %s523_s22 = sshll.u32 %s821_s19, 3 }
  0x1f   : > { %s183_s26 = scalar_lea.hbm %s1029_s0, %s523_s22  ;;  %s179_s27 = scalar_lea.vmem [#allocation5], %s522_s14 }
  0x20   : > { %s187_s28 = sshll.u32 %s179_s27, 4  ;;  %s185_s29 = sshll.u32 %s183_s26, 4  ;;  %s188_s28 = int_to_ptr.vmem [resolvable:$true] %s187_s28  ;;  %s186_s29 = int_to_ptr.hbm [resolvable:$true] %s185_s29 }
  0x21   : > { %p551_p8 = pnand %p562_p5, %p914_p11  ;;  %s202_s9 = scalar_lea.hbm %s1031_s2, %s523_s22 }
  0x22   : > { %s194_s3 = sand.u32 1, %s825_s20   ;;  %s176_s5 = scalar_lea.sflag [#allocation6], %s175_s13 }
  0x23   : > { %553 = dma.hbm_to_vmem [thread:$0]  (!%p551_p8), %s186_s29, 128, %s188_s28, %s176_s5  }
  0x24   : > { %s204_s11 = sshll.u32 %s202_s9, 4  ;;  %s198_s19 = scalar_lea.vmem [#allocation8], %s522_s14  ;;  %s205_s11 = int_to_ptr.hbm [resolvable:$true] %s204_s11 }
  0x25   : > { %s206_s17 = sshll.u32 %s198_s19, 4  ;;  %s195_s23 = scalar_lea.sflag [#allocation9], %s194_s3  ;;  %s207_s17 = int_to_ptr.vmem [resolvable:$true] %s206_s17 }
  0x26   : > { %556 = dma.hbm_to_vmem [thread:$0]  (!%p551_p8), %s205_s11, 128, %s207_s17, %s195_s23  }
  0x27   : > { %215 = sbr.rel (%p895_p3) target bundleno = 478 (0x1de), region = 32  ;;  %s953_s7 = sand.u32 (!%p895_p3), 1, %s809_s16  }
  0x28   : > { %s956_s22 = sshll.u32 (!%p895_p3), %s953_s7, 3  ;;  %s218_s5 = scalar_lea.sflag (!%p895_p3), [#allocation6], %s953_s7 }
  0x29   : > { %s221_s13 = scalar_lea.vmem (!%p895_p3), [#allocation5], %s956_s22 }
  0x2c   : > { %786 = dma.done.wait (%p920_p12), %s218_s5, 128  }
  0x2d   : > { %788 = vsyncadd (%p920_p12), %s218_s5, 4294967168  ;;  %s227_s3 = sand.u32 1, %s887_s21   ;;  %s231_s19 = scalar_lea.vmem [#allocation8], %s956_s22 }
  0x2e   : > { %s228_s17 = scalar_lea.sflag [#allocation9], %s227_s3 }
  0x2f   : > { %790 = dma.done.wait (%p920_p12), %s228_s17, 128  }
  0x30   : > { %792 = vsyncadd (%p920_p12), %s228_s17, 4294967168 }
  0x31   : > { %794 = dma.done.wait (%p56_p1), [#allocation9], 2048  }
  0x32   : > { %796 = vsyncadd (%p56_p1), [#allocation9], 4294965248  ;;  %v974_v0 = vld [vmem:[%s221_s13] sm:$0xff]  ;;  %s276_s14 = sshll.u32 %s1030_s1, 4  ;;  %s830_s24 = smov [#allocation2]   ;;  %s277_s14 = int_to_ptr.hbm [resolvable:$true] %s276_s14 }
  0x33   : > { %283 = vadd.xlane.f32.xlu0 %v974_v0  ;;  %s278_s26 = sshll.u32 %s830_s24, 4  ;;  %s264_s21 = scalar_lea.vmem [#allocation11], %s956_s22  ;;  %s279_s26 = int_to_ptr.vmem [resolvable:$true] %s278_s26 }
  0x34   : > { %281 = dma.hbm_to_vmem [thread:$0]  %s277_s14, 2048, %s279_s26, [#allocation3] }
  0xa6   : > { %v284_v1 = vpop.xlane.xlu0 %283 }
  0xa7   : > { %v285_v2 = vmax.f32 %v284_v1, 1.0 }
  0xa9   : > { %617 = vrcp.f32 %v285_v2  ;;  %v297_v6 = vand.u32 2147483648, %v285_v2  ;;  %v295_v8 = vand.u32 2147483647, %v285_v2  ;;  %vm291_vm1 = vweird.f32 %v285_v2 }
  0xab   : > { %v298_v10 = vor.u32 1.1754944e-38, %v297_v6  ;;  %vm296_vm3 = vcmp.eq.f32.partialorder %v295_v8, 8.507059e+37 }
  0xaf   : > { %v618_v3 = vpop.eup %617 }
  0xb0   : > { %v287_v4 = vmul.f32 %v618_v3, %v285_v2  ;;  %vm292_vm0 = vweird.f32 %v618_v3 }
  0xb1   : > { %vm293_vm2 = vmor %vm291_vm1, %vm292_vm0 }
  0xb2   : > { %v288_v5 = vsub.f32 1.0, %v287_v4 }
  0xb4   : > { %v289_v7 = vmul.f32 %v618_v3, %v288_v5 }
  0xb6   : > { %v290_v9 = vadd.f32 %v618_v3, %v289_v7 }
  0xb8   : > { %v294_v11 = vsel %vm293_vm2, %v618_v3, %v290_v9 }
  0xb9   : > { %v980_v12 = vsel %vm296_vm3, %v298_v10, %v294_v11 }
  0xba   : > { %797 = dma.done.wait [#allocation3], 2048 }
  0xbb   : > { %798 = vsyncadd [#allocation3], 4294965248  ;;  %v318_v13 = vld [vmem:[#allocation2 + $0x78] sm:$0xff]  ;;  %v317_v14 = vld [vmem:[#allocation2 + $0x70] sm:$0xff]  ;;  %s532_s8 = sshll.u32 %s817_s18, 3  ;;  %s395_s30 = sshll.u32 %s264_s21, 4  ;;  %s396_s30 = int_to_ptr.vmem [resolvable:$true] %s395_s30 }
  0xbc   : > { %319 = vmatpush.msra.mxu0 %v318_v13  ;;  %v316_v15 = vld [vmem:[#allocation2 + $0x68] sm:$0xff]  ;;  %v315_v16 = vld [vmem:[#allocation2 + $0x60] sm:$0xff]  ;;  %v359_v17 = vld [vmem:[#allocation10 + $0x78] sm:$0xff]  ;;  %s393_s29 = scalar_lea.hbm %s1033_s4, %s532_s8  ;;  %s382_s9 = scalar_lea.sflag [#allocation7], %s953_s7 }
  0xbd   : > { %v358_v18 = vld [vmem:[#allocation10 + $0x70] sm:$0xff]  ;;  %v314_v19 = vld [vmem:[#allocation2 + $0x58] sm:$0xff]  ;;  %360 = vmatpush.msra.mxu1 %v359_v17  ;;  %v357_v20 = vld [vmem:[#allocation10 + $0x68] sm:$0xff]  ;;  %s397_s6 = sshll.u32 %s393_s29, 4  ;;  %s753_s3 = scalar_lea.hbm %s1033_s4, 16  ;;  %s398_s6 = int_to_ptr.hbm [resolvable:$true] %s397_s6 }
  0xbe   : > { %320 = vmatpush.msra.mxu0 %v317_v14  ;;  %v313_v21 = vld [vmem:[#allocation2 + $0x50] sm:$0xff]  ;;  %v356_v22 = vld [vmem:[#allocation10 + $0x60] sm:$0xff]  ;;  %v312_v23 = vld [vmem:[#allocation2 + $0x48] sm:$0xff]  ;;  %s747_s23 = sshra.s32 %s398_s6, 4  ;;  %s748_s23 = int_to_ptr.hbm [resolvable:$true] %s747_s23 }
  0xbf   : > { %361 = vmatpush.msra.mxu1 %v358_v18  ;;  %v355_v24 = vld [vmem:[#allocation10 + $0x58] sm:$0xff]  ;;  %v311_v25 = vld [vmem:[#allocation2 + $0x40] sm:$0xff]  ;;  %v354_v26 = vld [vmem:[#allocation10 + $0x50] sm:$0xff]  ;;  %s749_s5 = scalar_lea.hbm %s748_s23, 8  ;;  %p754_p10 = scmp.lt.s32.totalorder %s748_s23, %s1033_s4 }
  0xc0   : > { %321 = vmatpush.msra.mxu0 %v316_v15  ;;  %v310_v27 = vld [vmem:[#allocation2 + $0x38] sm:$0xff]  ;;  %v353_v28 = vld [vmem:[#allocation10 + $0x48] sm:$0xff]  ;;  %v309_v29 = vld [vmem:[#allocation2 + $0x30] sm:$0xff]  ;;  %p750_p1 = scmp.ne.s32.totalorder %s748_s23, %s749_s5  ;;  %p755_p11 = scmp.lt.s32.totalorder %s753_s3, %s749_s5 }
  0xc1   : > { %362 = vmatpush.msra.mxu1 %v357_v20  ;;  %v352_v30 = vld [vmem:[#allocation10 + $0x40] sm:$0xff]  ;;  %v308_v31 = vld [vmem:[#allocation2 + $0x28] sm:$0xff]  ;;  %v351_v32 = vld [vmem:[#allocation10 + $0x38] sm:$0xff] }
  0xc2   : > { %322 = vmatpush.msra.mxu0 %v315_v16  ;;  %v307_v33 = vld [vmem:[#allocation2 + $0x20] sm:$0xff]  ;;  %v350_v34 = vld [vmem:[#allocation10 + $0x30] sm:$0xff]  ;;  %v306_v35 = vld [vmem:[#allocation2 + $0x18] sm:$0xff]  ;;  %p751_p3 = pnand %p750_p1, %p927_p4  ;;  %p756_p12 = por %p755_p11, %p754_p10 }
  0xc3   : > { %363 = vmatpush.msra.mxu1 %v356_v22  ;;  %v349_v36 = vld [vmem:[#allocation10 + $0x28] sm:$0xff]  ;;  %v305_v37 = vld [vmem:[#allocation2 + $0x10] sm:$0xff]  ;;  %v348_v38 = vld [vmem:[#allocation10 + $0x20] sm:$0xff] }
  0xc4   : > { %323 = vmatpush.msra.mxu0 %v314_v19  ;;  %v304_v39 = vld [vmem:[#allocation2 + $0x8] sm:$0xff]  ;;  %v347_v40 = vld [vmem:[#allocation10 + $0x18] sm:$0xff]  ;;  %v303_v41 = vld [vmem:[#allocation2] sm:$0xff]  ;;  %p752_p9 = pneg %p751_p3 }
  0xc5   : > { %364 = vmatpush.msra.mxu1 %v355_v24  ;;  %v346_v42 = vld [vmem:[#allocation10 + $0x10] sm:$0xff]  ;;  %v345_v43 = vld [vmem:[#allocation10 + $0x8] sm:$0xff]  ;;  %v344_v44 = vld [vmem:[#allocation10] sm:$0xff] }
  0xc6   : > { %324 = vmatpush.msra.mxu0 %v313_v21  ;;  %v339_v46 = vld [vmem:[%s231_s19] sm:$0xff]  ;;  %p757_p13 = pnand %p756_p12, %p752_p9 }
  0xc7   : > { %365 = vmatpush.msra.mxu1 %v354_v26 }
  0xc8   : > { %325 = vmatpush.msra.mxu0 %v312_v23 }
  0xc9   : > { %366 = vmatpush.msra.mxu1 %v353_v28 }
  0xca   : > { %326 = vmatpush.msra.mxu0 %v311_v25 }
  0xcb   : > { %367 = vmatpush.msra.mxu1 %v352_v30 }
  0xcc   : > { %327 = vmatpush.msra.mxu0 %v310_v27 }
  0xcd   : > { %368 = vmatpush.msra.mxu1 %v351_v32 }
  0xce   : > { %328 = vmatpush.msra.mxu0 %v309_v29 }
  0xcf   : > { %369 = vmatpush.msra.mxu1 %v350_v34 }
  0xd0   : > { %329 = vmatpush.msra.mxu0 %v308_v31 }
  0xd1   : > { %370 = vmatpush.msra.mxu1 %v349_v36 }
  0xd2   : > { %330 = vmatpush.msra.mxu0 %v307_v33 }
  0xd3   : > { %371 = vmatpush.msra.mxu1 %v348_v38 }
  0xd4   : > { %331 = vmatpush.msra.mxu0 %v306_v35 }
  0xd5   : > { %372 = vmatpush.msra.mxu1 %v347_v40 }
  0xd6   : > { %332 = vmatpush.msra.mxu0 %v305_v37 }
  0xd7   : > { %373 = vmatpush.msra.mxu1 %v346_v42 }
  0xd8   : > { %333 = vmatpush.msra.mxu0 %v304_v39 }
  0xd9   : > { %374 = vmatpush.msra.mxu1 %v345_v43 }
  0xda   : > { %334 = vmatpush.msra.mxu0 %v303_v41 }
  0xdb   : > { %335 = vmatmul.f32.vlgmr.msra.gmra.mxu0 %v974_v0  ;;  %375 = vmatpush.msra.mxu1 %v344_v44 }
 0x158   : > { %v336_v45 = vpop.f32.mrf.mxu0 }
 0x159   : > { %v340_v47 = vmul.f32 %v336_v45, %v980_v12 }
 0x15b   : > { %v341_v48 = vadd.f32 %v340_v47, %v339_v46 }
 0x15d   : > { %376 = vmatmul.f32.vlgmr.msra.gmra.mxu1 %v341_v48 }
 0x1da   : > { %v377_v49 = vpop.f32.mrf.mxu1 }
 0x1db   : > { %380 = vst [vmem:[%s264_s21] sm:$0xff] %v377_v49 }
 0x1dc   : > { %760 = shalt.err (!%p757_p13)
}
 0x1dd   : > { %544 = dma.vmem_to_hbm [thread:$0]  (%p927_p4), %s396_s30, 128, %s398_s6, %s382_s9  }
 0x1de PF: > { %s409_s7 = sand.u32 1, %s805_s15   ;;  %p558_p0 = pnand %p521_p6, %p935_p7 }
 0x1df   : > { %s410_s22 = scalar_lea.sflag [#allocation7], %s409_s7 }
 0x1e0   : > { %p559_p2 = pneg %p558_p0 }
 0x1e2   : > { %800 = dma.done.wait (%p559_p2), %s410_s22, 128  }
 0x1e3   : > { %802 = vsyncadd (%p559_p2), %s410_s22, 4294967168  ;;  %s23_s20 = sadd.s32 1, %s825_s20   ;;  %s1048_s25 = sld [smem:[#allocation21_spill]] }
 0x1e4   : > { %p20_p5 = scmp.ge.s32.totalorder %s23_s20, 4   ;;  %s1049_s17 = sld [smem:[#allocation24_spill]] }
 0x1e5   : > { %s1050_s18 = sld [smem:[#allocation22_spill]]  ;;  %s1052_s15 = smov %s809_s16 }
 0x1e6   : > { %s1051_s19 = sld [smem:[#allocation23_spill]]  ;;  %22 = sbr.rel (!%p20_p5) target bundleno = 10 (0xa), region = 103 }
 0x1e9   : > { %s1053_s16 = smov %s1048_s25 }
 0x1eb   :  { %416 = vsyncpa [#allocation6], 1 }
 0x1ec   :  { %418 = vsyncpa [#allocation6 + $0x1], 1 }
 0x1ed   :  { %419 = vsyncpa [#allocation9], 1 }
 0x1ee   :  { %421 = vsyncpa [#allocation9 + $0x1], 1 }
 0x1ef   :  { %422 = vsyncpa [#allocation7], 1 }
 0x1f0   :  { %424 = vsyncpa [#allocation7 + $0x1], 1 }
 0x1f1   :  { %425 = vsyncmov [#allocation3] }
 0x1f4   :  { %s426_s10 = vpop.sfrf %425 }
 0x1f5   :  { %p535_p6 = scmp.ne.s32.totalorder %s426_s10, 0 }
 0x1f7   :  { %430 = shalt.err (%p535_p6)  }

</bundles_post_ra>
